<compile_context>
chip_gen: v6e
topology: v6e:2x2x1
jax: 0.10.0
libtpu: 0.0.40
codegen_flags: <defaults>
</compile_context>

<pallas_src>
import functools

import jax
import jax.numpy as jnp
import numpy as np
from jax.experimental import pallas as pl
from jax.experimental.pallas import tpu as pltpu

BN_EPS = 1e-5


def _round_up(n, m):
    return ((n + m - 1) // m) * m


def _slab_layout(layer_sizes, inner_dim):
    """Row offsets (8-aligned) and padded width (128-aligned) of the param slab."""
    D0, D1, D2, D3, D4 = [int(s) for s in layer_sizes]
    I = int(inner_dim)
    RW1 = 0                                  # W1  : (D0, D1)
    RW2 = RW1 + _round_up(D0, 8)             # W2  : (D1, D2+I)   [mu2 | s1]
    RW3 = RW2 + _round_up(D1, 8)             # W3  : (D2, D3+I)   [mu3 | s2]
    RW4 = RW3 + _round_up(D2, 8)             # W4  : (D3, I+D4)   [s3  | mu4]
    RW5 = RW4 + _round_up(D3, 8)             # W5  : (3I, D4)
    RP = RW5 + _round_up(3 * I, 8)           # P   : (8, wmax) packed BN/bias rows
    rows = RP + 8
    width = _round_up(max(D1, D2 + I, D3 + I, I + D4, D4), 128)
    return dict(RW1=RW1, RW2=RW2, RW3=RW3, RW4=RW4, RW5=RW5, RP=RP,
                rows=rows, width=width)


def _forward_kernel(x_ref, slab_ref, out_ref, *,
                    D0, D1, D2, D3, D4, I, RW1, RW2, RW3, RW4, RW5, RP):
    def bn_relu(h, gamma, beta):
        # BatchNorm1d, training mode: biased batch stats per feature column.
        m = jnp.mean(h, axis=0, keepdims=True)
        c = h - m
        v = jnp.mean(c * c, axis=0, keepdims=True)
        return jnp.maximum(c * jax.lax.rsqrt(v + BN_EPS) * gamma + beta, 0.0)

    # Packed (8, width) tile of BN gammas/betas + final-layer biases.
    p = slab_ref[RP:RP + 8, :]

    # ---- Stage 1: fc_mu1 (bias cancelled by BN) -> BN -> ReLU --------------
    h1 = jnp.dot(x_ref[...], slab_ref[RW1:RW1 + D0, :D1],
                 preferred_element_type=jnp.float32)
    o1 = bn_relu(h1, p[0:1, :D1], p[1:2, :D1])

    # ---- Stage 2: fused [fc_mu2 | fc_sigma1] -> per-column BN -> ReLU ------
    h2 = jnp.dot(o1, slab_ref[RW2:RW2 + D1, :D2 + I],
                 preferred_element_type=jnp.float32)
    s2 = bn_relu(h2, p[2:3, :D2 + I], p[3:4, :D2 + I])
    o2, uo1 = s2[:, :D2], s2[:, D2:D2 + I]

    # ---- Stage 3: fused [fc_mu3 | fc_sigma2] -> per-column BN -> ReLU ------
    h3 = jnp.dot(o2, slab_ref[RW3:RW3 + D2, :D3 + I],
                 preferred_element_type=jnp.float32)
    s3 = bn_relu(h3, p[4:5, :D3 + I], p[5:6, :D3 + I])
    o3, uo2 = s3[:, :D3], s3[:, D3:D3 + I]

    # ---- Stage 4: fused [fc_sigma3 | fc_mu4] (sigma block at lane 0) -------
    h4 = jnp.dot(o3, slab_ref[RW4:RW4 + D3, :I + D4],
                 preferred_element_type=jnp.float32)
    uo3 = bn_relu(h4[:, :I], p[6:7, :I], p[7:8, :I])
    mu = jnp.maximum(h4[:, I:I + D4] + p[6:7, I:I + D4], 0.0)

    # ---- Stage 5: fc_sigma4(cat(uo1,uo2,uo3)) + bias, exp ------------------
    # The concat is a sum of three row-block matmuls against W5 (identical
    # math, avoids in-kernel lane concatenation; MRB accumulates on v7x).
    w5 = slab_ref[RW5:RW5 + 3 * I, :D4]
    ls = (jnp.dot(uo1, w5[:I], preferred_element_type=jnp.float32)
          + jnp.dot(uo2, w5[I:2 * I], preferred_element_type=jnp.float32)
          + jnp.dot(uo3, w5[2 * I:], preferred_element_type=jnp.float32)
          + p[7:8, I:I + D4])
    sigma = jnp.exp(ls)

    # Single merged output: [mu | sigma], sliced apart in the wrapper.
    out_ref[...] = jnp.concatenate([mu, sigma], axis=1)


def make_raw_params(layer_sizes, inner_dim, key):
    """Raw PyTorch-layout parameters (weights (out,in), per-module biases)."""
    D0, D1, D2, D3, D4 = [int(s) for s in layer_sizes]
    I = int(inner_dim)
    ks = jax.random.split(key, 16)

    def linear(kw, kb, out_d, in_d):
        w = 0.01 * jax.random.normal(kw, (out_d, in_d), jnp.float32)
        b = jax.random.uniform(kb, (out_d,), jnp.float32, -0.1, 0.1)
        return w, b

    def bn(kg, kb, n):
        # PyTorch default init is gamma=1, beta=0; randomize slightly so the
        # packed-parameter plumbing is actually exercised by the check.
        g = 1.0 + 0.1 * jax.random.normal(kg, (n,), jnp.float32)
        be = 0.05 * jax.random.normal(kb, (n,), jnp.float32)
        return g, be

    w_mu1, b_mu1 = linear(ks[0], ks[1], D1, D0)
    w_mu2, b_mu2 = linear(ks[2], ks[3], D2, D1)
    w_mu3, b_mu3 = linear(ks[4], ks[5], D3, D2)
    w_mu4, b_mu4 = linear(ks[6], ks[7], D4, D3)
    w_s1, b_s1 = linear(ks[8], ks[9], I, D1)
    w_s2, b_s2 = linear(ks[10], ks[11], I, D2)
    w_s3, b_s3 = linear(ks[12], ks[13], I, D3)
    w_s4, b_s4 = linear(ks[14], ks[15], D4, 3 * I)

    kbn = jax.random.split(jax.random.fold_in(key, 1), 12)
    g_mu1, be_mu1 = bn(kbn[0], kbn[1], D1)
    g_mu2, be_mu2 = bn(kbn[2], kbn[3], D2)
    g_mu3, be_mu3 = bn(kbn[4], kbn[5], D3)
    g_s1, be_s1 = bn(kbn[6], kbn[7], I)
    g_s2, be_s2 = bn(kbn[8], kbn[9], I)
    g_s3, be_s3 = bn(kbn[10], kbn[11], I)

    return dict(
        w_mu1=w_mu1, b_mu1=b_mu1, w_mu2=w_mu2, b_mu2=b_mu2,
        w_mu3=w_mu3, b_mu3=b_mu3, w_mu4=w_mu4, b_mu4=b_mu4,
        w_s1=w_s1, b_s1=b_s1, w_s2=w_s2, b_s2=b_s2,
        w_s3=w_s3, b_s3=b_s3, w_s4=w_s4, b_s4=b_s4,
        g_mu1=g_mu1, be_mu1=be_mu1, g_mu2=g_mu2, be_mu2=be_mu2,
        g_mu3=g_mu3, be_mu3=be_mu3,
        g_s1=g_s1, be_s1=be_s1, g_s2=g_s2, be_s2=be_s2,
        g_s3=g_s3, be_s3=be_s3)


def pack_params(raw, layer_sizes, inner_dim):
    """One-time host-side packing of ALL kernel parameters into ONE f32 slab."""
    D0, D1, D2, D3, D4 = [int(s) for s in layer_sizes]
    I = int(inner_dim)
    lay = _slab_layout(layer_sizes, inner_dim)

    W1 = raw["w_mu1"].T                                                # (D0, D1)
    W2 = jnp.concatenate([raw["w_mu2"].T, raw["w_s1"].T], axis=1)      # (D1, D2+I)
    W3 = jnp.concatenate([raw["w_mu3"].T, raw["w_s2"].T], axis=1)      # (D2, D3+I)
    # sigma3 block first so the BN'd block lands at lane offset 0 in stage 4.
    W4 = jnp.concatenate([raw["w_s3"].T, raw["w_mu4"].T], axis=1)      # (D3, I+D4)
    W5 = raw["w_s4"].T                                                 # (3I, D4)

    # NOTE: biases of fc_mu1/2/3 and fc_sigma1/2/3 are deliberately NOT packed:
    # they are cancelled by the training-mode BN mean subtraction.
    wmax = max(D1, D2 + I, D3 + I, I + D4)
    # Rows 6/7 pack [g_s3 | b_mu4] and [be_s3 | b_s4]; guard the shared layout.
    assert wmax >= I + D4, "packed-param rows 6/7 would overflow"
    P = jnp.zeros((8, wmax), jnp.float32)
    P = P.at[0, :D1].set(raw["g_mu1"])
    P = P.at[1, :D1].set(raw["be_mu1"])
    P = P.at[2, :D2 + I].set(jnp.concatenate([raw["g_mu2"], raw["g_s1"]]))
    P = P.at[3, :D2 + I].set(jnp.concatenate([raw["be_mu2"], raw["be_s1"]]))
    P = P.at[4, :D3 + I].set(jnp.concatenate([raw["g_mu3"], raw["g_s2"]]))
    P = P.at[5, :D3 + I].set(jnp.concatenate([raw["be_mu3"], raw["be_s2"]]))
    P = P.at[6, :I + D4].set(jnp.concatenate([raw["g_s3"], raw["b_mu4"]]))
    P = P.at[7, :I + D4].set(jnp.concatenate([raw["be_s3"], raw["b_s4"]]))

    slab = jnp.zeros((lay["rows"], lay["width"]), jnp.float32)
    slab = slab.at[lay["RW1"]:lay["RW1"] + D0, :D1].set(W1)
    slab = slab.at[lay["RW2"]:lay["RW2"] + D1, :D2 + I].set(W2)
    slab = slab.at[lay["RW3"]:lay["RW3"] + D2, :D3 + I].set(W3)
    slab = slab.at[lay["RW4"]:lay["RW4"] + D3, :I + D4].set(W4)
    slab = slab.at[lay["RW5"]:lay["RW5"] + 3 * I, :D4].set(W5)
    slab = slab.at[lay["RP"]:lay["RP"] + 8, :wmax].set(P)
    return slab


def make_forward(layer_sizes, inner_dim):
    D0, D1, D2, D3, D4 = [int(s) for s in layer_sizes]
    I = int(inner_dim)
    lay = _slab_layout(layer_sizes, inner_dim)
    kernel = functools.partial(
        _forward_kernel, D0=D0, D1=D1, D2=D2, D3=D3, D4=D4, I=I,
        RW1=lay["RW1"], RW2=lay["RW2"], RW3=lay["RW3"], RW4=lay["RW4"],
        RW5=lay["RW5"], RP=lay["RP"])

    @jax.jit
    def forward(x, slab):
        B = x.shape[0]
        flops = 2 * B * (D0 * D1 + D1 * (D2 + I) + D2 * (D3 + I)
                         + D3 * (I + D4) + 3 * I * D4)
        transcendentals = B * D4 + (D1 + (D2 + I) + (D3 + I) + I)  # exp + rsqrt
        bytes_accessed = 4 * (B * D0 + lay["rows"] * lay["width"] + B * 2 * D4)
        vmem = pl.BlockSpec(memory_space=pltpu.MemorySpace.VMEM)
        out = pl.pallas_call(
            kernel,
            out_shape=jax.ShapeDtypeStruct((B, 2 * D4), jnp.float32),
            in_specs=[vmem, vmem],
            out_specs=vmem,
            cost_estimate=pl.CostEstimate(flops=flops,
                                          transcendentals=transcendentals,
                                          bytes_accessed=bytes_accessed),
        )(x, slab)
        return out[:, :D4], out[:, D4:]

    return forward


def _reference_forward(x, raw):
    """Plain-JAX reference mirroring the PyTorch forward in training mode
    (includes every bias, so it also validates the BN bias-cancellation)."""
    def bn(h, g, be):
        m = jnp.mean(h, axis=0, keepdims=True)
        v = jnp.mean((h - m) ** 2, axis=0, keepdims=True)
        return (h - m) / jnp.sqrt(v + BN_EPS) * g + be

    relu = lambda t: jnp.maximum(t, 0.0)
    o1 = relu(bn(x @ raw["w_mu1"].T + raw["b_mu1"], raw["g_mu1"], raw["be_mu1"]))
    o2 = relu(bn(o1 @ raw["w_mu2"].T + raw["b_mu2"], raw["g_mu2"], raw["be_mu2"]))
    o3 = relu(bn(o2 @ raw["w_mu3"].T + raw["b_mu3"], raw["g_mu3"], raw["be_mu3"]))
    mu = relu(o3 @ raw["w_mu4"].T + raw["b_mu4"])
    uo1 = relu(bn(o1 @ raw["w_s1"].T + raw["b_s1"], raw["g_s1"], raw["be_s1"]))
    uo2 = relu(bn(o2 @ raw["w_s2"].T + raw["b_s2"], raw["g_s2"], raw["be_s2"]))
    uo3 = relu(bn(o3 @ raw["w_s3"].T + raw["b_s3"], raw["g_s3"], raw["be_s3"]))
    uo = jnp.concatenate([uo1, uo2, uo3], axis=1)
    sigma = jnp.exp(uo @ raw["w_s4"].T + raw["b_s4"])
    return mu, sigma


if __name__ == "__main__":
    layer_sizes = [16, 64, 32, 16, 3]
    inner_dim = 8
    batch = 16

    key = jax.random.PRNGKey(0)
    kx, kp = jax.random.split(key)
    x = jax.random.normal(kx, (batch, layer_sizes[0]), jnp.float32)

    raw = make_raw_params(layer_sizes, inner_dim, kp)
    slab = pack_params(raw, layer_sizes, inner_dim)   # hoisted param prep (once)
    forward = make_forward(layer_sizes, inner_dim)    # jitted wrapper

    mu, sigma = forward(x, slab)
    mu, sigma = jax.block_until_ready((mu, sigma))

    ref_mu, ref_sigma = _reference_forward(x, raw)
    assert mu.shape == (batch, layer_sizes[-1])
    assert sigma.shape == (batch, layer_sizes[-1])
    np.testing.assert_allclose(np.asarray(mu), np.asarray(ref_mu),
                               rtol=1e-4, atol=1e-4)
    np.testing.assert_allclose(np.asarray(sigma), np.asarray(ref_sigma),
                               rtol=1e-4, atol=1e-4)

    print("KERNEL_OK")
</pallas_src>

<mosaic_0001>
module attributes {stable_mosaic.version = 11 : i64} {
  func.func @_forward_kernel(%arg0: memref<16x16xf32, #tpu.memory_space<vmem>>, %arg1: memref<160x128xf32, #tpu.memory_space<vmem>>, %arg2: memref<16x6xf32, #tpu.memory_space<vmem>>) attributes {dimension_semantics = [], scalar_prefetch = 0 : i64, scratch_operands = 0 : i64, tpu.core_type = #tpu.core_type<tc>} {
    %c152 = arith.constant 152 : index
    %c0 = arith.constant 0 : index
    %0 = vector.load %arg1[%c152, %c0] : memref<160x128xf32, #tpu.memory_space<vmem>>, vector<8x128xf32>
    %c0_0 = arith.constant 0 : index
    %c0_1 = arith.constant 0 : index
    %1 = vector.load %arg0[%c0_0, %c0_1] : memref<16x16xf32, #tpu.memory_space<vmem>>, vector<16x16xf32>
    %c0_2 = arith.constant 0 : index
    %c0_3 = arith.constant 0 : index
    %2 = vector.load %arg1[%c0_2, %c0_3] : memref<160x128xf32, #tpu.memory_space<vmem>>, vector<16x64xf32>
    %cst = arith.constant dense<0.000000e+00> : vector<16x64xf32>
    %3 = tpu.matmul %1, %2, %cst {dimension_numbers = #tpu.dot_dimension_numbers<[1], [0], [0], [1], [0, 0, 1, 1], [], []>} : vector<16x16xf32>, vector<16x64xf32>, vector<16x64xf32> -> vector<16x64xf32>
    %4 = vector.extract_strided_slice %0 {offsets = [0, 0], sizes = [1, 64], strides = [1, 1]} : vector<8x128xf32> to vector<1x64xf32>
    %5 = vector.extract_strided_slice %0 {offsets = [1, 0], sizes = [1, 64], strides = [1, 1]} : vector<8x128xf32> to vector<1x64xf32>
    %cst_4 = arith.constant dense<0.000000e+00> : vector<64xf32>
    %6 = vector.multi_reduction <add>, %3, %cst_4 [0] : vector<16x64xf32> to vector<64xf32>
    %7 = vector.shape_cast %6 : vector<64xf32> to vector<1x64xf32>
    %cst_5 = arith.constant 1.600000e+01 : f32
    %8 = vector.broadcast %cst_5 : f32 to vector<1x64xf32>
    %9 = arith.divf %7, %8 : vector<1x64xf32>
    %10 = vector.broadcast %9 : vector<1x64xf32> to vector<16x64xf32>
    %11 = arith.subf %3, %10 : vector<16x64xf32>
    %12 = arith.mulf %11, %11 : vector<16x64xf32>
    %cst_6 = arith.constant dense<0.000000e+00> : vector<64xf32>
    %13 = vector.multi_reduction <add>, %12, %cst_6 [0] : vector<16x64xf32> to vector<64xf32>
    %14 = vector.shape_cast %13 : vector<64xf32> to vector<1x64xf32>
    %cst_7 = arith.constant 1.600000e+01 : f32
    %15 = vector.broadcast %cst_7 : f32 to vector<1x64xf32>
    %16 = arith.divf %14, %15 : vector<1x64xf32>
    %cst_8 = arith.constant 9.99999974E-6 : f32
    %17 = vector.broadcast %cst_8 : f32 to vector<1x64xf32>
    %18 = arith.addf %16, %17 : vector<1x64xf32>
    %19 = math.rsqrt %18 : vector<1x64xf32>
    %20 = vector.broadcast %19 : vector<1x64xf32> to vector<16x64xf32>
    %21 = arith.mulf %11, %20 : vector<16x64xf32>
    %22 = vector.broadcast %4 : vector<1x64xf32> to vector<16x64xf32>
    %23 = arith.mulf %21, %22 : vector<16x64xf32>
    %24 = vector.broadcast %5 : vector<1x64xf32> to vector<16x64xf32>
    %25 = arith.addf %23, %24 : vector<16x64xf32>
    %cst_9 = arith.constant 0.000000e+00 : f32
    %26 = vector.broadcast %cst_9 : f32 to vector<16x64xf32>
    %27 = arith.maximumf %25, %26 : vector<16x64xf32>
    %c16 = arith.constant 16 : index
    %c0_10 = arith.constant 0 : index
    %28 = vector.load %arg1[%c16, %c0_10] : memref<160x128xf32, #tpu.memory_space<vmem>>, vector<64x40xf32>
    %cst_11 = arith.constant dense<0.000000e+00> : vector<16x40xf32>
    %29 = tpu.matmul %27, %28, %cst_11 {dimension_numbers = #tpu.dot_dimension_numbers<[1], [0], [0], [1], [0, 0, 1, 1], [], []>} : vector<16x64xf32>, vector<64x40xf32>, vector<16x40xf32> -> vector<16x40xf32>
    %30 = vector.extract_strided_slice %0 {offsets = [2, 0], sizes = [1, 40], strides = [1, 1]} : vector<8x128xf32> to vector<1x40xf32>
    %31 = vector.extract_strided_slice %0 {offsets = [3, 0], sizes = [1, 40], strides = [1, 1]} : vector<8x128xf32> to vector<1x40xf32>
    %cst_12 = arith.constant dense<0.000000e+00> : vector<40xf32>
    %32 = vector.multi_reduction <add>, %29, %cst_12 [0] : vector<16x40xf32> to vector<40xf32>
    %33 = vector.shape_cast %32 : vector<40xf32> to vector<1x40xf32>
    %cst_13 = arith.constant 1.600000e+01 : f32
    %34 = vector.broadcast %cst_13 : f32 to vector<1x40xf32>
    %35 = arith.divf %33, %34 : vector<1x40xf32>
    %36 = vector.broadcast %35 : vector<1x40xf32> to vector<16x40xf32>
    %37 = arith.subf %29, %36 : vector<16x40xf32>
    %38 = arith.mulf %37, %37 : vector<16x40xf32>
    %cst_14 = arith.constant dense<0.000000e+00> : vector<40xf32>
    %39 = vector.multi_reduction <add>, %38, %cst_14 [0] : vector<16x40xf32> to vector<40xf32>
    %40 = vector.shape_cast %39 : vector<40xf32> to vector<1x40xf32>
    %cst_15 = arith.constant 1.600000e+01 : f32
    %41 = vector.broadcast %cst_15 : f32 to vector<1x40xf32>
    %42 = arith.divf %40, %41 : vector<1x40xf32>
    %cst_16 = arith.constant 9.99999974E-6 : f32
    %43 = vector.broadcast %cst_16 : f32 to vector<1x40xf32>
    %44 = arith.addf %42, %43 : vector<1x40xf32>
    %45 = math.rsqrt %44 : vector<1x40xf32>
    %46 = vector.broadcast %45 : vector<1x40xf32> to vector<16x40xf32>
    %47 = arith.mulf %37, %46 : vector<16x40xf32>
    %48 = vector.broadcast %30 : vector<1x40xf32> to vector<16x40xf32>
    %49 = arith.mulf %47, %48 : vector<16x40xf32>
    %50 = vector.broadcast %31 : vector<1x40xf32> to vector<16x40xf32>
    %51 = arith.addf %49, %50 : vector<16x40xf32>
    %cst_17 = arith.constant 0.000000e+00 : f32
    %52 = vector.broadcast %cst_17 : f32 to vector<16x40xf32>
    %53 = arith.maximumf %51, %52 : vector<16x40xf32>
    %54 = vector.extract_strided_slice %53 {offsets = [0, 0], sizes = [16, 32], strides = [1, 1]} : vector<16x40xf32> to vector<16x32xf32>
    %55 = vector.extract_strided_slice %53 {offsets = [0, 32], sizes = [16, 8], strides = [1, 1]} : vector<16x40xf32> to vector<16x8xf32>
    %c80 = arith.constant 80 : index
    %c0_18 = arith.constant 0 : index
    %56 = vector.load %arg1[%c80, %c0_18] : memref<160x128xf32, #tpu.memory_space<vmem>>, vector<32x24xf32>
    %cst_19 = arith.constant dense<0.000000e+00> : vector<16x24xf32>
    %57 = tpu.matmul %54, %56, %cst_19 {dimension_numbers = #tpu.dot_dimension_numbers<[1], [0], [0], [1], [0, 0, 1, 1], [], []>} : vector<16x32xf32>, vector<32x24xf32>, vector<16x24xf32> -> vector<16x24xf32>
    %58 = vector.extract_strided_slice %0 {offsets = [4, 0], sizes = [1, 24], strides = [1, 1]} : vector<8x128xf32> to vector<1x24xf32>
    %59 = vector.extract_strided_slice %0 {offsets = [5, 0], sizes = [1, 24], strides = [1, 1]} : vector<8x128xf32> to vector<1x24xf32>
    %cst_20 = arith.constant dense<0.000000e+00> : vector<24xf32>
    %60 = vector.multi_reduction <add>, %57, %cst_20 [0] : vector<16x24xf32> to vector<24xf32>
    %61 = vector.shape_cast %60 : vector<24xf32> to vector<1x24xf32>
    %cst_21 = arith.constant 1.600000e+01 : f32
    %62 = vector.broadcast %cst_21 : f32 to vector<1x24xf32>
    %63 = arith.divf %61, %62 : vector<1x24xf32>
    %64 = vector.broadcast %63 : vector<1x24xf32> to vector<16x24xf32>
    %65 = arith.subf %57, %64 : vector<16x24xf32>
    %66 = arith.mulf %65, %65 : vector<16x24xf32>
    %cst_22 = arith.constant dense<0.000000e+00> : vector<24xf32>
    %67 = vector.multi_reduction <add>, %66, %cst_22 [0] : vector<16x24xf32> to vector<24xf32>
    %68 = vector.shape_cast %67 : vector<24xf32> to vector<1x24xf32>
    %cst_23 = arith.constant 1.600000e+01 : f32
    %69 = vector.broadcast %cst_23 : f32 to vector<1x24xf32>
    %70 = arith.divf %68, %69 : vector<1x24xf32>
    %cst_24 = arith.constant 9.99999974E-6 : f32
    %71 = vector.broadcast %cst_24 : f32 to vector<1x24xf32>
    %72 = arith.addf %70, %71 : vector<1x24xf32>
    %73 = math.rsqrt %72 : vector<1x24xf32>
    %74 = vector.broadcast %73 : vector<1x24xf32> to vector<16x24xf32>
    %75 = arith.mulf %65, %74 : vector<16x24xf32>
    %76 = vector.broadcast %58 : vector<1x24xf32> to vector<16x24xf32>
    %77 = arith.mulf %75, %76 : vector<16x24xf32>
    %78 = vector.broadcast %59 : vector<1x24xf32> to vector<16x24xf32>
    %79 = arith.addf %77, %78 : vector<16x24xf32>
    %cst_25 = arith.constant 0.000000e+00 : f32
    %80 = vector.broadcast %cst_25 : f32 to vector<16x24xf32>
    %81 = arith.maximumf %79, %80 : vector<16x24xf32>
    %82 = vector.extract_strided_slice %81 {offsets = [0, 0], sizes = [16, 16], strides = [1, 1]} : vector<16x24xf32> to vector<16x16xf32>
    %83 = vector.extract_strided_slice %81 {offsets = [0, 16], sizes = [16, 8], strides = [1, 1]} : vector<16x24xf32> to vector<16x8xf32>
    %c112 = arith.constant 112 : index
    %c0_26 = arith.constant 0 : index
    %84 = vector.load %arg1[%c112, %c0_26] : memref<160x128xf32, #tpu.memory_space<vmem>>, vector<16x11xf32>
    %cst_27 = arith.constant dense<0.000000e+00> : vector<16x11xf32>
    %85 = tpu.matmul %82, %84, %cst_27 {dimension_numbers = #tpu.dot_dimension_numbers<[1], [0], [0], [1], [0, 0, 1, 1], [], []>} : vector<16x16xf32>, vector<16x11xf32>, vector<16x11xf32> -> vector<16x11xf32>
    %86 = vector.extract_strided_slice %85 {offsets = [0, 0], sizes = [16, 8], strides = [1, 1]} : vector<16x11xf32> to vector<16x8xf32>
    %87 = vector.extract_strided_slice %0 {offsets = [6, 0], sizes = [1, 8], strides = [1, 1]} : vector<8x128xf32> to vector<1x8xf32>
    %88 = vector.extract_strided_slice %0 {offsets = [7, 0], sizes = [1, 8], strides = [1, 1]} : vector<8x128xf32> to vector<1x8xf32>
    %cst_28 = arith.constant dense<0.000000e+00> : vector<8xf32>
    %89 = vector.multi_reduction <add>, %86, %cst_28 [0] : vector<16x8xf32> to vector<8xf32>
    %90 = vector.shape_cast %89 : vector<8xf32> to vector<1x8xf32>
    %cst_29 = arith.constant 1.600000e+01 : f32
    %91 = vector.broadcast %cst_29 : f32 to vector<1x8xf32>
    %92 = arith.divf %90, %91 : vector<1x8xf32>
    %93 = vector.broadcast %92 : vector<1x8xf32> to vector<16x8xf32>
    %94 = arith.subf %86, %93 : vector<16x8xf32>
    %95 = arith.mulf %94, %94 : vector<16x8xf32>
    %cst_30 = arith.constant dense<0.000000e+00> : vector<8xf32>
    %96 = vector.multi_reduction <add>, %95, %cst_30 [0] : vector<16x8xf32> to vector<8xf32>
    %97 = vector.shape_cast %96 : vector<8xf32> to vector<1x8xf32>
    %cst_31 = arith.constant 1.600000e+01 : f32
    %98 = vector.broadcast %cst_31 : f32 to vector<1x8xf32>
    %99 = arith.divf %97, %98 : vector<1x8xf32>
    %cst_32 = arith.constant 9.99999974E-6 : f32
    %100 = vector.broadcast %cst_32 : f32 to vector<1x8xf32>
    %101 = arith.addf %99, %100 : vector<1x8xf32>
    %102 = math.rsqrt %101 : vector<1x8xf32>
    %103 = vector.broadcast %102 : vector<1x8xf32> to vector<16x8xf32>
    %104 = arith.mulf %94, %103 : vector<16x8xf32>
    %105 = vector.broadcast %87 : vector<1x8xf32> to vector<16x8xf32>
    %106 = arith.mulf %104, %105 : vector<16x8xf32>
    %107 = vector.broadcast %88 : vector<1x8xf32> to vector<16x8xf32>
    %108 = arith.addf %106, %107 : vector<16x8xf32>
    %cst_33 = arith.constant 0.000000e+00 : f32
    %109 = vector.broadcast %cst_33 : f32 to vector<16x8xf32>
    %110 = arith.maximumf %108, %109 : vector<16x8xf32>
    %111 = vector.extract_strided_slice %85 {offsets = [0, 8], sizes = [16, 3], strides = [1, 1]} : vector<16x11xf32> to vector<16x3xf32>
    %112 = vector.extract_strided_slice %0 {offsets = [6, 8], sizes = [1, 3], strides = [1, 1]} : vector<8x128xf32> to vector<1x3xf32>
    %113 = vector.broadcast %112 : vector<1x3xf32> to vector<16x3xf32>
    %114 = arith.addf %111, %113 : vector<16x3xf32>
    %cst_34 = arith.constant 0.000000e+00 : f32
    %115 = vector.broadcast %cst_34 : f32 to vector<16x3xf32>
    %116 = arith.maximumf %114, %115 : vector<16x3xf32>
    %c128 = arith.constant 128 : index
    %c0_35 = arith.constant 0 : index
    %117 = vector.load %arg1[%c128, %c0_35] : memref<160x128xf32, #tpu.memory_space<vmem>>, vector<24x3xf32>
    %118 = vector.extract_strided_slice %117 {offsets = [0, 0], sizes = [8, 3], strides = [1, 1]} : vector<24x3xf32> to vector<8x3xf32>
    %cst_36 = arith.constant dense<0.000000e+00> : vector<16x3xf32>
    %119 = tpu.matmul %55, %118, %cst_36 {dimension_numbers = #tpu.dot_dimension_numbers<[1], [0], [0], [1], [0, 0, 1, 1], [], []>} : vector<16x8xf32>, vector<8x3xf32>, vector<16x3xf32> -> vector<16x3xf32>
    %120 = vector.extract_strided_slice %117 {offsets = [8, 0], sizes = [8, 3], strides = [1, 1]} : vector<24x3xf32> to vector<8x3xf32>
    %cst_37 = arith.constant dense<0.000000e+00> : vector<16x3xf32>
    %121 = tpu.matmul %83, %120, %cst_37 {dimension_numbers = #tpu.dot_dimension_numbers<[1], [0], [0], [1], [0, 0, 1, 1], [], []>} : vector<16x8xf32>, vector<8x3xf32>, vector<16x3xf32> -> vector<16x3xf32>
    %122 = arith.addf %119, %121 : vector<16x3xf32>
    %123 = vector.extract_strided_slice %117 {offsets = [16, 0], sizes = [8, 3], strides = [1, 1]} : vector<24x3xf32> to vector<8x3xf32>
    %cst_38 = arith.constant dense<0.000000e+00> : vector<16x3xf32>
    %124 = tpu.matmul %110, %123, %cst_38 {dimension_numbers = #tpu.dot_dimension_numbers<[1], [0], [0], [1], [0, 0, 1, 1], [], []>} : vector<16x8xf32>, vector<8x3xf32>, vector<16x3xf32> -> vector<16x3xf32>
    %125 = arith.addf %122, %124 : vector<16x3xf32>
    %126 = vector.extract_strided_slice %0 {offsets = [7, 8], sizes = [1, 3], strides = [1, 1]} : vector<8x128xf32> to vector<1x3xf32>
    %127 = vector.broadcast %126 : vector<1x3xf32> to vector<16x3xf32>
    %128 = arith.addf %125, %127 : vector<16x3xf32>
    %129 = math.exp %128 : vector<16x3xf32>
    %130 = tpu.concatenate %116, %129 in 1 : vector<16x3xf32>, vector<16x3xf32> -> vector<16x6xf32>
    %c0_39 = arith.constant 0 : index
    %c0_40 = arith.constant 0 : index
    %131 = vector.load %arg2[%c0_39, %c0_40] : memref<16x6xf32, #tpu.memory_space<vmem>>, vector<16x6xf32>
    tpu.vector_store %arg2[%c0_39, %c0_40], %130 {strides = array<i32>} : memref<16x6xf32, #tpu.memory_space<vmem>>, vector<16x6xf32>,
    return
  }
}

</mosaic_0001>

<bundles_post_ra>
// kernel: forward.1
= control target key start
LH: loop header
LB: loop body
LE: loop exit
PB: predicated region body
PF: predicated region fallthrough
CT: control target
= control target key end

     0   :  { %7 = vsyncpa [#allocation3], 0  ;;  %s1104_s0 = inlined_call_operand.hbm [shape: f32[16,16], index: 0, kind: input, shape index: {}]   ;;  %s1105_s1 = inlined_call_operand.hbm [shape: f32[160,128], index: 1, kind: input, shape index: {}]   ;;  %s1106_s2 = inlined_call_operand.vmem [shape: f32[16,6], index: 2, kind: output, shape index: {}]  }
   0x1   :  { %8 = vsyncpa [#allocation5], 0  ;;  %s1021_s9 = smov [#allocation2]  }
   0x2   :  { %s14_s10 = sshll.u32 %s1021_s9, 4  ;;  %s15_s10 = int_to_ptr.vmem [resolvable:$true] %s14_s10 }
   0x3   :  { %s985_s11 = scalar_lea.vmem %s15_s10, 256  ;;  %p990_p1 = scmp.lt.s32.totalorder %s15_s10, %s15_s10 }
   0x4   :  { %p986_p0 = scmp.ne.s32.totalorder %s15_s10, %s985_s11  ;;  %p991_p2 = scmp.lt.s32.totalorder %s985_s11, %s985_s11 }
   0x6   :  { %p992_p3 = por %p991_p2, %p990_p1 }
   0x8   :  { %p993_p4 = pnand %p992_p3, %p986_p0 }
   0xa   :  { %996 = shalt.err (!%p993_p4)
}
   0xb   :  { %s1022_s12 = smov 128   ;;  %s1023_s13 = smov 8  }
   0xc   :  { %20 = dma.hbm_to_vmem [thread:$0]  %s1104_s0, 256, %s15_s10, [#allocation3], %s1022_s12, %s1022_s12, %s1023_s13  }
   0xd   :  { %s1024_s16 = smov [#allocation4]  }
   0xe   :  { %s26_s17 = sshll.u32 %s1024_s16, 4  ;;  %s27_s17 = int_to_ptr.vmem [resolvable:$true] %s26_s17 }
   0xf   :  { %s1005_s18 = scalar_lea.vmem %s27_s17, 2560  ;;  %p1010_p6 = scmp.lt.s32.totalorder %s27_s17, %s27_s17 }
  0x10   :  { %p1006_p5 = scmp.ne.s32.totalorder %s27_s17, %s1005_s18  ;;  %p1011_p7 = scmp.lt.s32.totalorder %s1005_s18, %s1005_s18 }
  0x12   :  { %p1012_p8 = por %p1011_p7, %p1010_p6 }
  0x14   :  { %p1013_p9 = pnand %p1012_p8, %p1006_p5 }
  0x16   :  { %1016 = shalt.err (!%p1013_p9)
}
  0x17   :  { %32 = dma.hbm_to_vmem [thread:$0]  %s1105_s1, 2560, %s27_s17, [#allocation5], %s1022_s12, %s1022_s12, %s1023_s13  }
  0x18   :  { %1017 = dma.done.wait [#allocation3], 256  }
  0x19   :  { %1018 = vsyncadd [#allocation3], 4294967040 }
  0x1a   :  { %1019 = dma.done.wait [#allocation5], 2560  }
  0x1b   :  { %1020 = vsyncadd [#allocation5], 4294964736  ;;  %vm44_vm0 = vcmask 130048   ;;  %v43_v0 = vld [vmem:[#allocation4 + $0x8] sm:$0xff]  ;;  %v42_v1 = vld [vmem:[#allocation4] sm:$0xff]  ;;  %vm126_vm1 = vcmask 523264   ;;  %v156_v39 = vlaneseq }
  0x1c   :  { %v40_v2 = vld [vmem:[#allocation2] sm:$0xff]  ;;  %898 = vmatprep.subr.mxu0 %v43_v0  ;;  %v41_v3 = vld [vmem:[#allocation2 + $0x8] sm:$0xff]  ;;  %v177_v4 = vld [vmem:[#allocation4 + $0x48] sm:$0xff]  ;;  %vm259_vm2 = vcmask 326656   ;;  %vm306_vm3 = vcmask 261120   ;;  %s1025_s0 = smov 96  }
  0x1d   :  { %902 = vmatprep.mubr.msk.f32.mxu0 %vm44_vm0, %v40_v2  ;;  %899 = vmatpush3.msra.mxu0 %v43_v0  ;;  %v176_v5 = vld [vmem:[#allocation4 + $0x40] sm:$0xff]  ;;  %v175_v6 = vld [vmem:[#allocation4 + $0x38] sm:$0xff]  ;;  %v174_v7 = vld [vmem:[#allocation4 + $0x30] sm:$0xff]  ;;  %v1056_v40 = vshrl.u32 %v156_v39, 7  ;;  %vm514_vm4 = vcmask 64512   ;;  %vm388_vm5 = vcmask 195584  }
  0x1e   :  { %900 = vmatprep.subr.mxu0 %v42_v1  ;;  %905 = vmatprep.subr.mxu1 %v177_v4  ;;  %v173_v8 = vld [vmem:[#allocation4 + $0x28] sm:$0xff]  ;;  %v172_v9 = vld [vmem:[#allocation4 + $0x20] sm:$0xff]  ;;  %v171_v10 = vld [vmem:[#allocation4 + $0x18] sm:$0xff]  ;;  %s1026_s1 = smov 112   ;;  %s1027_s21 = smov 120   ;;  %vm839_vm6 = vcmask 23552  }
  0x1f   :  { %901 = vmatpush3.msra.mxu0 %v42_v1  ;;  %906 = vmatpush3.msra.mxu1 %v177_v4  ;;  %v170_v11 = vld [vmem:[#allocation4 + $0x10] sm:$0xff]  ;;  %v158_v41 = vsub.s32 0, %v1056_v40  ;;  %v1059_v42 = vld [vmem:[#allocation4 + $0x98] sm:$0xff]  ;;  %v164_v43 = vsub.s32 1, %v1056_v40  ;;  %v305_v55 = vld [vmem:[#allocation4 + $0x68] sm:$0xff]  ;;  %s1028_s22 = smov 3  }
  0x20   :  { %903 = vmatmul.mubr.msk.f32.vlgmr.msra.gmra.mxu0 %vm44_vm0, %v41_v3  ;;  %907 = vmatprep.subr.mxu1 %v176_v5  ;;  %v304_v56 = vld [vmem:[#allocation4 + $0x60] sm:$0xff]  ;;  %v303_v57 = vld [vmem:[#allocation4 + $0x58] sm:$0xff]  ;;  %v302_v58 = vld [vmem:[#allocation4 + $0x50] sm:$0xff]  ;;  %vm842_vm7 = vcmask 48128  }
  0x21   :  { %908 = vmatpush3.msra.mxu1 %v176_v5  ;;  %v159_v44 = vrot.slane %v1059_v42, %v158_v41  ;;  %v165_v48 = vrot.slane %v1059_v42, %v164_v43  ;;  %924 = vmatprep.subr.mxu0 %v305_v55  ;;  %v431_v39 = vld [vmem:[#allocation4 + $0x70] sm:$0xff] }
  0x22   :  { %909 = vmatprep.subr.mxu1 %v175_v6  ;;  %925 = vmatpush3.msra.mxu0 %v305_v55 }
  0x23   :  { %910 = vmatpush3.msra.mxu1 %v175_v6  ;;  %926 = vmatprep.subr.mxu0 %v304_v56 }
  0x24   :  { %911 = vmatprep.subr.mxu1 %v174_v7  ;;  %927 = vmatpush3.msra.mxu0 %v304_v56 }
  0x25   :  { %912 = vmatpush3.msra.mxu1 %v174_v7  ;;  %928 = vmatprep.subr.mxu0 %v303_v57 }
  0x26   :  { %913 = vmatprep.subr.mxu1 %v173_v8  ;;  %929 = vmatpush3.msra.mxu0 %v303_v57 }
  0x27   :  { %914 = vmatpush3.msra.mxu1 %v173_v8  ;;  %930 = vmatprep.subr.mxu0 %v302_v58 }
  0x28   :  { %915 = vmatprep.subr.mxu1 %v172_v9  ;;  %931 = vmatpush3.msra.mxu0 %v302_v58 }
  0x29   :  { %916 = vmatpush3.msra.mxu1 %v172_v9 }
  0x2a   :  { %917 = vmatprep.subr.mxu1 %v171_v10 }
  0x2b   :  { %918 = vmatpush3.msra.mxu1 %v171_v10 }
  0x2c   :  { %919 = vmatprep.subr.mxu1 %v170_v11 }
  0x2d   :  { %920 = vmatpush3.msra.mxu1 %v170_v11 }
  0xe0   :  { %v904_v12 = vpop.f32.mrf.mxu0 }
  0xe1   :  { %v128_v14 = vsel %vm126_vm1, %v904_v12, 0.0 }
  0xe2   :  { %v117_v13 = vpop.f32.mrf.mxu0 }
  0xe3   :  { %v127_v15 = vsel %vm126_vm1, %v117_v13, 0.0 }
  0xe4   :  { %v129_v16 = vadd.f32 %v128_v14, %v127_v15 }
  0xe6   :  { %v130_v17 = vrot.slane %v129_v16, 4 }
  0xe8   :  { %v131_v18 = vadd.f32 %v130_v17, %v129_v16 }
  0xea   :  { %v132_v19 = vrot.slane %v131_v18, 2 }
  0xec   :  { %v133_v20 = vadd.f32 %v132_v19, %v131_v18 }
  0xee   :  { %v134_v21 = vrot.slane %v133_v20, 1 }
  0xf0   :  { %v135_v22 = vadd.f32 %v134_v21, %v133_v20 }
  0xf2   :  { %v137_v23 = vmul.f32 0.0625, %v135_v22  ;;  %v290_v22 = vsub.s32 2, %v1056_v40 }
  0xf4   :  { %v138_v24 = vsub.f32 %v117_v13, %v137_v23  ;;  %v139_v25 = vsub.f32 %v904_v12, %v137_v23  ;;  %v561_v23 = vld [vmem:[#allocation4 + $0x80] sm:$0xff] }
  0xf5   :  { %947 = vmatprep.subr.mxu1 %v561_v23 }
  0xf6   :  { %v140_v26 = vmul.f32 %v138_v24, %v138_v24  ;;  %v141_v27 = vmul.f32 %v139_v25, %v139_v25 }
  0xf8   :  { %v142_v28 = vsel %vm126_vm1, %v140_v26, 0.0  ;;  %v143_v29 = vsel %vm126_vm1, %v141_v27, 0.0 }
  0xf9   :  { %v144_v30 = vadd.f32 %v143_v29, %v142_v28 }
  0xfb   :  { %v145_v31 = vrot.slane %v144_v30, 4 }
  0xfd   :  { %v146_v32 = vadd.f32 %v145_v31, %v144_v30 }
  0xff   :  { %v147_v33 = vrot.slane %v146_v32, 2 }
 0x101   :  { %v148_v34 = vadd.f32 %v147_v33, %v146_v32 }
 0x103   :  { %v149_v35 = vrot.slane %v148_v34, 1 }
 0x105   :  { %v150_v36 = vadd.f32 %v149_v35, %v148_v34 }
 0x107   :  { %v151_v37 = vmul.f32 0.0625, %v150_v36 }
 0x109   :  { %v152_v38 = vadd.f32 1e-05, %v151_v37 }
 0x10b   :  { %965 = vrsqrt.f32 %v152_v38  ;;  %v432_v38 = vld [vmem:[#allocation4 + $0x78] sm:$0xff] }
 0x10c   :  { %935 = vmatprep.subr.mxu0 %v432_v38 }
 0x118   :  { %v966_v45 = vpop.eup %965 }
 0x119   :  { %v154_v46 = vmul.f32 %v966_v45, %v138_v24  ;;  %v155_v47 = vmul.f32 %v966_v45, %v139_v25  ;;  %v296_v24 = vsub.s32 3, %v1056_v40  ;;  %v291_v25 = vrot.slane %v1059_v42, %v290_v22 }
 0x11b   :  { %v160_v49 = vmul.f32 %v159_v44, %v154_v46  ;;  %v161_v50 = vmul.f32 %v159_v44, %v155_v47  ;;  %v297_v29 = vrot.slane %v1059_v42, %v296_v24  ;;  %v545_v24 = vsub.s32 6, %v1056_v40 }
 0x11d   :  { %v166_v51 = vadd.f32 %v165_v48, %v160_v49  ;;  %v167_v52 = vadd.f32 %v165_v48, %v161_v50 }
 0x11f   :  { %v168_v53 = vmax.f32 %v166_v51, 0.0  ;;  %v169_v54 = vmax.f32 %v167_v52, 0.0 }
 0x121   :  { %921 = vmatprep.mubr.msk.f32.mxu1 %vm126_vm1, %v168_v53 }
 0x122   :  { %922 = vmatmul.mubr.msk.f32.vlgmr.msra.gmra.mxu1 %vm126_vm1, %v169_v54 }
 0x123   :  { %948 = vmatpush3.msra.mxu1 %v561_v23  ;;  %v563_v23 = vld [vmem:[#allocation4 + $0x90] sm:$0xff] }
 0x1e2   :  { %v923_v59 = vpop.f32.mrf.mxu1 }
 0x1e3   :  { %v261_v61 = vsel %vm259_vm2, %v923_v59, 0.0 }
 0x1e4   :  { %v250_v60 = vpop.f32.mrf.mxu1 }
 0x1e5   :  { %v260_v62 = vsel %vm259_vm2, %v250_v60, 0.0 }
 0x1e6   :  { %v262_v63 = vadd.f32 %v261_v61, %v260_v62 }
 0x1e8   :  { %v263_v0 = vrot.slane %v262_v63, 4 }
 0x1ea   :  { %v264_v1 = vadd.f32 %v263_v0, %v262_v63 }
 0x1ec   :  { %v265_v2 = vrot.slane %v264_v1, 2 }
 0x1ee   :  { %v266_v3 = vadd.f32 %v265_v2, %v264_v1 }
 0x1f0   :  { %v267_v4 = vrot.slane %v266_v3, 1 }
 0x1f2   :  { %v268_v5 = vadd.f32 %v267_v4, %v266_v3 }
 0x1f4   :  { %v269_v6 = vmul.f32 0.0625, %v268_v5  ;;  %v419_v5 = vsub.s32 4, %v1056_v40 }
 0x1f6   :  { %v270_v7 = vsub.f32 %v250_v60, %v269_v6  ;;  %v271_v8 = vsub.f32 %v923_v59, %v269_v6  ;;  %v562_v6 = vld [vmem:[#allocation4 + $0x88] sm:$0xff] }
 0x1f8   :  { %v272_v9 = vmul.f32 %v270_v7, %v270_v7  ;;  %v273_v10 = vmul.f32 %v271_v8, %v271_v8 }
 0x1fa   :  { %v274_v11 = vsel %vm259_vm2, %v272_v9, 0.0  ;;  %v275_v12 = vsel %vm259_vm2, %v273_v10, 0.0 }
 0x1fb   :  { %v276_v13 = vadd.f32 %v275_v12, %v274_v11 }
 0x1fd   :  { %v277_v14 = vrot.slane %v276_v13, 4 }
 0x1ff   :  { %v278_v15 = vadd.f32 %v277_v14, %v276_v13 }
 0x201   :  { %v279_v16 = vrot.slane %v278_v15, 2 }
 0x203   :  { %v280_v17 = vadd.f32 %v279_v16, %v278_v15 }
 0x205   :  { %v281_v18 = vrot.slane %v280_v17, 1 }
 0x207   :  { %v282_v19 = vadd.f32 %v281_v18, %v280_v17 }
 0x209   :  { %v283_v20 = vmul.f32 0.0625, %v282_v19  ;;  %v551_v19 = vsub.s32 7, %v1056_v40 }
 0x20b   :  { %v284_v21 = vadd.f32 1e-05, %v283_v20  ;;  %v552_v20 = vrot.slane %v1059_v42, %v551_v19 }
 0x20d   :  { %967 = vrsqrt.f32 %v284_v21 }
 0x21a   :  { %v968_v26 = vpop.eup %967 }
 0x21b   :  { %v286_v27 = vmul.f32 %v968_v26, %v270_v7  ;;  %v287_v28 = vmul.f32 %v968_v26, %v271_v8  ;;  %v425_v7 = vsub.s32 5, %v1056_v40  ;;  %v420_v8 = vrot.slane %v1059_v42, %v419_v5 }
 0x21d   :  { %v292_v30 = vmul.f32 %v291_v25, %v286_v27  ;;  %v293_v31 = vmul.f32 %v291_v25, %v287_v28  ;;  %v426_v12 = vrot.slane %v1059_v42, %v425_v7  ;;  %v546_v25 = vrot.slane %v1059_v42, %v545_v24 }
 0x21f   :  { %v298_v32 = vadd.f32 %v297_v29, %v292_v30  ;;  %v299_v33 = vadd.f32 %v297_v29, %v293_v31 }
 0x221   :  { %v300_v34 = vmax.f32 %v298_v32, 0.0  ;;  %v301_v35 = vmax.f32 %v299_v33, 0.0 }
 0x223   :  { %647 = vrot.lane.b32.xlu1 %v300_v34, %s1025_s0  ;;  %932 = vmatprep.mubr.msk.f32.mxu0 %vm306_vm3, %v300_v34 }
 0x224   :  { %933 = vmatmul.mubr.msk.f32.vlgmr.msra.gmra.mxu0 %vm306_vm3, %v301_v35 }
 0x225   :  { %936 = vmatpush3.msra.mxu0 %v432_v38 }
 0x226   :  { %937 = vmatprep.subr.mxu0 %v431_v39 }
 0x227   :  { %649 = vrot.lane.b32.xlu1 %v301_v35, %s1025_s0  ;;  %938 = vmatpush3.msra.mxu0 %v431_v39 }
 0x228   :  { %942 = vmatprep.subr.mxu0 %v562_v6 }
 0x295   :  { %v648_v36 = vpop.permute.xlu1 %647 }
 0x296   :  { %949 = vmatprep.mubr.msk.f32.mxu1 %vm514_vm4, %v648_v36 }
 0x299   :  { %v650_v37 = vpop.permute.xlu1 %649 }
 0x29a   :  { %950 = vmatmul.mubr.msk.f32.vlgmr.msra.gmra.mxu1 %vm514_vm4, %v650_v37 }
 0x2e4   :  { %v934_v41 = vpop.f32.mrf.mxu0 }
 0x2e5   :  { %v390_v44 = vsel %vm388_vm5, %v934_v41, 0.0 }
 0x2e6   :  { %v379_v43 = vpop.f32.mrf.mxu0 }
 0x2e7   :  { %v389_v45 = vsel %vm388_vm5, %v379_v43, 0.0 }
 0x2e8   :  { %v391_v46 = vadd.f32 %v390_v44, %v389_v45 }
 0x2ea   :  { %v392_v47 = vrot.slane %v391_v46, 4 }
 0x2ec   :  { %v393_v48 = vadd.f32 %v392_v47, %v391_v46 }
 0x2ee   :  { %v394_v49 = vrot.slane %v393_v48, 2 }
 0x2f0   :  { %v395_v50 = vadd.f32 %v394_v49, %v393_v48 }
 0x2f2   :  { %v396_v51 = vrot.slane %v395_v50, 1 }
 0x2f4   :  { %v397_v52 = vadd.f32 %v396_v51, %v395_v50 }
 0x2f6   :  { %v398_v53 = vmul.f32 0.0625, %v397_v52 }
 0x2f8   :  { %v399_v54 = vsub.f32 %v379_v43, %v398_v53  ;;  %v400_v55 = vsub.f32 %v934_v41, %v398_v53 }
 0x2fa   :  { %v401_v56 = vmul.f32 %v399_v54, %v399_v54  ;;  %v402_v57 = vmul.f32 %v400_v55, %v400_v55 }
 0x2fc   :  { %v403_v58 = vsel %vm388_vm5, %v401_v56, 0.0  ;;  %v404_v59 = vsel %vm388_vm5, %v402_v57, 0.0 }
 0x2fd   :  { %v405_v60 = vadd.f32 %v404_v59, %v403_v58 }
 0x2ff   :  { %v406_v61 = vrot.slane %v405_v60, 4 }
 0x301   :  { %v407_v62 = vadd.f32 %v406_v61, %v405_v60 }
 0x303   :  { %v408_v63 = vrot.slane %v407_v62, 2 }
 0x305   :  { %v409_v0 = vadd.f32 %v408_v63, %v407_v62 }
 0x307   :  { %v410_v1 = vrot.slane %v409_v0, 1 }
 0x309   :  { %v411_v2 = vadd.f32 %v410_v1, %v409_v0 }
 0x30b   :  { %v412_v3 = vmul.f32 0.0625, %v411_v2 }
 0x30d   :  { %v413_v4 = vadd.f32 1e-05, %v412_v3 }
 0x30f   :  { %969 = vrsqrt.f32 %v413_v4 }
 0x31c   :  { %v970_v9 = vpop.eup %969 }
 0x31d   :  { %v415_v10 = vmul.f32 %v970_v9, %v399_v54  ;;  %v416_v11 = vmul.f32 %v970_v9, %v400_v55 }
 0x31f   :  { %v421_v13 = vmul.f32 %v420_v8, %v415_v10  ;;  %v422_v14 = vmul.f32 %v420_v8, %v416_v11 }
 0x321   :  { %v427_v15 = vadd.f32 %v426_v12, %v421_v13  ;;  %v428_v16 = vadd.f32 %v426_v12, %v422_v14 }
 0x323   :  { %v429_v17 = vmax.f32 %v427_v15, 0.0  ;;  %v430_v18 = vmax.f32 %v428_v16, 0.0 }
 0x325   :  { %564 = vrot.lane.b32.xlu0 %v429_v17, %s1026_s1  ;;  %939 = vmatprep.mubr.msk.f32.mxu0 %vm44_vm0, %v429_v17 }
 0x326   :  { %940 = vmatmul.mubr.msk.f32.vlgmr.msra.gmra.mxu0 %vm44_vm0, %v430_v18 }
 0x327   :  { %943 = vmatpush3.msra.mxu0 %v562_v6 }
 0x328   :  { %952 = vmatprep.subr.mxu0 %v563_v23 }
 0x329   :  { %566 = vrot.lane.b32.xlu0 %v430_v18, %s1026_s1 }
 0x32d   :  { %814 = vrot.lane.b32.xlu0 %v552_v20, %s1027_s21 }
 0x35a   :  { %v951_v3 = vpop.f32.mrf.mxu1 }
 0x35c   :  { %v721_v6 = vpop.f32.mrf.mxu1 }
 0x397   :  { %v565_v21 = vpop.permute.xlu0 %564 }
 0x398   :  { %944 = vmatprep.mubr.msk.f32.mxu0 %vm514_vm4, %v565_v21 }
 0x39b   :  { %v567_v22 = vpop.permute.xlu0 %566 }
 0x39c   :  { %945 = vmatmul.mubr.msk.f32.vlgmr.msra.gmra.mxu0 %vm514_vm4, %v567_v22 }
 0x39d   :  { %953 = vmatpush3.msra.mxu0 %v563_v23 }
 0x39f   :  { %v815_v10 = vpop.permute.xlu0 %814 }
 0x3e6   :  { %v941_v26 = vpop.f32.mrf.mxu0 }
 0x3e7   :  { %v558_v27 = vadd.f32 %v941_v26, %v546_v25  ;;  %v516_v29 = vsel %vm514_vm4, %v941_v26, 0.0 }
 0x3e8   :  { %v505_v28 = vpop.f32.mrf.mxu0 }
 0x3e9   :  { %v515_v30 = vsel %vm514_vm4, %v505_v28, 0.0  ;;  %v557_v31 = vadd.f32 %v546_v25, %v505_v28  ;;  %v560_v32 = vmax.f32 %v558_v27, 0.0 }
 0x3ea   :  { %v517_v33 = vadd.f32 %v516_v29, %v515_v30 }
 0x3eb   :  { %827 = vrot.lane.b32.xlu0 %v560_v32, %s1027_s21  ;;  %v559_v34 = vmax.f32 %v557_v31, 0.0 }
 0x3ec   :  { %v518_v35 = vrot.slane %v517_v33, 4 }
 0x3ed   :  { %825 = vrot.lane.b32.xlu1 %v559_v34, %s1027_s21 }
 0x3ee   :  { %v519_v36 = vadd.f32 %v518_v35, %v517_v33 }
 0x3f0   :  { %v520_v37 = vrot.slane %v519_v36, 2 }
 0x3f2   :  { %v521_v38 = vadd.f32 %v520_v37, %v519_v36 }
 0x3f4   :  { %v522_v40 = vrot.slane %v521_v38, 1 }
 0x3f6   :  { %v523_v39 = vadd.f32 %v522_v40, %v521_v38 }
 0x3f8   :  { %v524_v42 = vmul.f32 0.0625, %v523_v39 }
 0x3fa   :  { %v525_v41 = vsub.f32 %v505_v28, %v524_v42  ;;  %v526_v43 = vsub.f32 %v941_v26, %v524_v42 }
 0x3fc   :  { %v527_v44 = vmul.f32 %v525_v41, %v525_v41  ;;  %v528_v45 = vmul.f32 %v526_v43, %v526_v43 }
 0x3fe   :  { %v529_v46 = vsel %vm514_vm4, %v527_v44, 0.0  ;;  %v530_v47 = vsel %vm514_vm4, %v528_v45, 0.0 }
 0x3ff   :  { %v531_v48 = vadd.f32 %v530_v47, %v529_v46 }
 0x401   :  { %v532_v49 = vrot.slane %v531_v48, 4 }
 0x403   :  { %v533_v50 = vadd.f32 %v532_v49, %v531_v48 }
 0x405   :  { %v534_v51 = vrot.slane %v533_v50, 2 }
 0x407   :  { %v535_v52 = vadd.f32 %v534_v51, %v533_v50 }
 0x409   :  { %v536_v53 = vrot.slane %v535_v52, 1 }
 0x40b   :  { %v537_v54 = vadd.f32 %v536_v53, %v535_v52 }
 0x40d   :  { %v538_v55 = vmul.f32 0.0625, %v537_v54 }
 0x40f   :  { %v539_v56 = vadd.f32 1e-05, %v538_v55 }
 0x411   :  { %971 = vrsqrt.f32 %v539_v56 }
 0x41e   :  { %v972_v57 = vpop.eup %971 }
 0x41f   :  { %v541_v58 = vmul.f32 %v972_v57, %v525_v41  ;;  %v542_v59 = vmul.f32 %v972_v57, %v526_v43 }
 0x421   :  { %v547_v60 = vmul.f32 %v546_v25, %v541_v58  ;;  %v548_v61 = vmul.f32 %v546_v25, %v542_v59 }
 0x423   :  { %v553_v62 = vadd.f32 %v552_v20, %v547_v60  ;;  %v554_v63 = vadd.f32 %v552_v20, %v548_v61 }
 0x425   :  { %v555_v0 = vmax.f32 %v553_v62, 0.0  ;;  %v556_v1 = vmax.f32 %v554_v63, 0.0 }
 0x427   :  { %954 = vmatprep.mubr.msk.f32.mxu0 %vm514_vm4, %v555_v0 }
 0x428   :  { %955 = vmatmul.mubr.msk.f32.vlgmr.msra.gmra.mxu0 %vm514_vm4, %v556_v1 }
 0x45c   :  { %v946_v2 = vpop.f32.mrf.mxu0 }
 0x45d   :  { %v727_v5 = vadd.f32 %v951_v3, %v946_v2  ;;  %v828_v19 = vpop.permute.xlu0 %827 }
 0x45e   :  { %v638_v4 = vpop.f32.mrf.mxu0 }
 0x45f   :  { %v722_v8 = vadd.f32 %v721_v6, %v638_v4  ;;  %v826_v20 = vpop.permute.xlu1 %825 }
 0x4e8   :  { %v956_v7 = vpop.f32.mrf.mxu0 }
 0x4e9   :  { %v812_v9 = vadd.f32 %v956_v7, %v727_v5 }
 0x4ea   :  { %v802_v11 = vpop.f32.mrf.mxu0 }
 0x4eb   :  { %v818_v12 = vadd.f32 %v815_v10, %v812_v9  ;;  %v811_v13 = vadd.f32 %v802_v11, %v722_v8 }
 0x4ed   :  { %v821_v14 = vmul.f32 1.442695, %v818_v12  ;;  %v817_v15 = vadd.f32 %v815_v10, %v811_v13 }
 0x4ef   :  { %973 = vpow2.f32 %v821_v14  ;;  %v819_v16 = vmul.f32 1.442695, %v817_v15 }
 0x4f1   :  { %975 = vpow2.f32 %v819_v16 }
 0x4fc   :  { %v974_v17 = vpop.eup %973 }
 0x4fd   :  { %835 = vrot.lane.b32.xlu0 %v974_v17, %s1028_s22 }
 0x4fe   :  { %v976_v18 = vpop.eup %975 }
 0x4ff   :  { %833 = vrot.lane.b32.xlu1 %v976_v18, %s1028_s22 }
 0x56f   :  { %v836_v21 = vpop.permute.xlu0 %835 }
 0x570   :  { %v841_v22 = vsel %vm839_vm6, %v828_v19, %v836_v21 }
 0x571   :  { %844 = vst.msk [vmem:[%s1106_s2 + $0x8] sm:$0xff] %vm842_vm7, %v841_v22  ;;  %v834_v23 = vpop.permute.xlu1 %833 }
 0x572   :  { %v840_v24 = vsel %vm839_vm6, %v826_v20, %v834_v23 }
 0x573   :  { %843 = vst.msk [vmem:[%s1106_s2] sm:$0xff] %vm842_vm7, %v840_v24 }
 0x574   :  { %849 = vsyncpa [#allocation3], 1 }
 0x575   :  { %850 = vsyncpa [#allocation5], 1 }

</bundles_post_ra>
